<compile_context>
chip_gen: v5e
topology: v5e:2x2
jax: 0.10.0
libtpu: 0.0.40
codegen_flags: <defaults>
</compile_context>

<pallas_src>
import jax
import jax.numpy as jnp
from jax.experimental import pallas as pl
from jax.experimental.pallas import tpu as pltpu


def _round_up(a: int, m: int) -> int:
    return ((a + m - 1) // m) * m


def _make_linear_kernel(tk: int, f_valid: int, nk: int, w_resident: bool, mask_k_tail: bool):
    """Kernel factory; all arguments are static Python values baked in at trace time."""

    def kernel(x_ref, w_ref, b_ref, o_ref):
        # x_ref: (tm, tk)            activation tile (unpadded HBM source)
        # w_ref: (Fp, Cp) resident   OR (tk, Cp) per-k tile; already transposed [F, C] layout
        # b_ref: (1, Cp)             bias row
        # o_ref: (tm, Cp) f32        output tile, resident across the k axis (accumulator)
        k = pl.program_id(1)

        # Fold the bias into the k==0 init of the resident output block:
        # no separate accumulator scratch and no finalize pass.
        @pl.when(k == 0)
        def _init():
            o_ref[...] = jnp.broadcast_to(b_ref[...], o_ref.shape).astype(o_ref.dtype)

        x = x_ref[...]
        if mask_k_tail:
            # The last k tile extends past F (x is not padded in HBM); zero stale columns
            # so they cannot contaminate the contraction.
            col = jax.lax.broadcasted_iota(jnp.int32, x.shape, 1)
            x = jnp.where(col < (f_valid - k * tk), x, jnp.zeros_like(x))

        if w_resident and nk > 1:
            off = pl.multiple_of(k * tk, tk)
            w = w_ref[pl.ds(off, tk), :]
        else:
            w = w_ref[...]

        o_ref[...] += jnp.dot(x, w, preferred_element_type=jnp.float32).astype(o_ref.dtype)

    return kernel


def logistic_regression_forward(
    x, weight, bias, *, tm_max=512, tk_max=1024, w_resident_max_bytes=4 * 1024 * 1024
):
    """x: [B, F], weight: [C, F] (PyTorch layout), bias: [C] -> logits [B, C] (float32)."""
    B, F = x.shape
    C = weight.shape[0]
    x = x.astype(jnp.float32)  # match nn.Linear f32 numerics (1e-5 tolerance)
    itemsize = 4

    Cp = _round_up(C, 128)  # lane-dense output / weight minor dim

    # ---- contraction (F) tiling: x is never padded or copied in HBM ----
    if F <= tk_max:
        tk, nk, Fp = F, 1, F             # block covers full F (legal even if F % 128 != 0)
        mask_k_tail = False
    else:
        tk = tk_max                       # multiple of 128
        nk = pl.cdiv(F, tk)
        Fp = nk * tk
        mask_k_tail = (F % tk) != 0       # ragged last k tile -> in-kernel mask

    # ---- batch (B) tiling: accept a ragged last block instead of padding x ----
    if B < 8:
        tm = B                            # block == full sublane dim
    else:
        tm = min(tm_max, (B // 8) * 8)    # multiple of 8, never larger than the array
    nb = pl.cdiv(B, tm)

    # ---- weight / bias: single padded, pre-transposed copy ([C, F] -> [Fp, Cp]) ----
    wp = jnp.zeros((Fp, Cp), jnp.float32).at[:F, :C].set(weight.astype(jnp.float32).T)
    bp = jnp.zeros((1, Cp), jnp.float32).at[0, :C].set(bias.astype(jnp.float32))

    w_bytes = Fp * Cp * itemsize
    w_resident = w_bytes <= w_resident_max_bytes
    if w_resident:
        # Constant index_map -> DMA'd into VMEM once, never re-fetched.
        w_spec = pl.BlockSpec((Fp, Cp), lambda i, k: (0, 0))
        w_block_rows = Fp
    else:
        # Re-fetched per k only (independent of the batch-tile index i).
        w_spec = pl.BlockSpec((tk, Cp), lambda i, k: (k, 0))
        w_block_rows = tk

    kernel = _make_linear_kernel(tk, F, nk, w_resident, mask_k_tail)

    # Explicit VMEM budget (double-buffered upper bound) with headroom; safe on v5e/v6e/v7x.
    est_vmem = 2 * (tm * tk + w_block_rows * Cp + tm * Cp + Cp) * itemsize
    vmem_limit = int(min(max(est_vmem * 2, 32 * 1024 * 1024), 56 * 1024 * 1024))

    cost = pl.CostEstimate(
        flops=2 * B * F * Cp,
        transcendentals=0,
        bytes_accessed=(B * F + (1 if w_resident else nb) * Fp * Cp + B * Cp + Cp) * itemsize,
    )

    out_p = pl.pallas_call(
        kernel,
        out_shape=jax.ShapeDtypeStruct((B, Cp), jnp.float32),
        grid_spec=pltpu.PrefetchScalarGridSpec(
            num_scalar_prefetch=0,
            grid=(nb, nk),                                       # k (reduction) innermost
            in_specs=[
                pl.BlockSpec((tm, tk), lambda i, k: (i, k)),     # x tile (read exactly once)
                w_spec,                                          # weight (resident or per-k)
                pl.BlockSpec((1, Cp), lambda i, k: (0, 0)),      # bias row
            ],
            out_specs=pl.BlockSpec((tm, Cp), lambda i, k: (i, 0)),  # resident across k
        ),
        compiler_params=pltpu.CompilerParams(
            dimension_semantics=("parallel", "arbitrary"),
            vmem_limit_bytes=vmem_limit,
        ),
        cost_estimate=cost,
    )(x, wp, bp)

    return out_p[:, :C]


if __name__ == "__main__":
    # Small shapes consistent with the module: batch=8, in_features=32, num_classes=10
    batch, in_features, num_classes = 8, 32, 10

    key = jax.random.PRNGKey(0)
    kx, kw, kb = jax.random.split(key, 3)

    x = jax.random.normal(kx, (batch, in_features), dtype=jnp.float32)
    # Deterministic parameter init (mimics nn.Linear uniform(-1/sqrt(F), 1/sqrt(F)))
    bound = 1.0 / jnp.sqrt(jnp.float32(in_features))
    weight = jax.random.uniform(kw, (num_classes, in_features),
                                minval=-bound, maxval=bound, dtype=jnp.float32)
    bias = jax.random.uniform(kb, (num_classes,),
                              minval=-bound, maxval=bound, dtype=jnp.float32)

    out = logistic_regression_forward(x, weight, bias)
    out = jax.block_until_ready(out)

    # Correctness check against plain JAX reference
    ref = x @ weight.T + bias
    assert out.shape == (batch, num_classes)
    assert jnp.allclose(out, ref, atol=1e-5, rtol=1e-5)

    print("KERNEL_OK")
</pallas_src>

<mosaic_0001>
module attributes {stable_mosaic.version = 11 : i64} {
  func.func @kernel(%arg0: i32, %arg1: i32, %arg2: memref<8x32xf32, #tpu.memory_space<vmem>>, %arg3: memref<32x128xf32, #tpu.memory_space<vmem>>, %arg4: memref<1x128xf32, #tpu.memory_space<vmem>>, %arg5: memref<8x128xf32, #tpu.memory_space<vmem>>) attributes {dimension_semantics = [#tpu.dimension_semantics<parallel>, #tpu.dimension_semantics<arbitrary>], iteration_bounds = array<i64: 1, 1>, scalar_prefetch = 0 : i64, scratch_operands = 0 : i64, tpu.core_type = #tpu.core_type<tc>, window_params = [{transform_indices = @transform_0, window_bounds = array<i64: 8, 32>}, {pipeline_mode = #tpu.pipeline_mode<synchronous>, transform_indices = @transform_1, window_bounds = array<i64: 32, 128>}, {pipeline_mode = #tpu.pipeline_mode<synchronous>, transform_indices = @transform_2, window_bounds = array<i64: 1, 128>}, {transform_indices = @transform_3, window_bounds = array<i64: 8, 128>}]} {
    %c0_i32 = arith.constant 0 : i32
    %0 = arith.cmpi eq, %arg1, %c0_i32 : i32
    %1 = arith.extui %0 : i1 to i32
    %c0_i32_0 = arith.constant 0 : i32
    %2 = arith.cmpi ne, %1, %c0_i32_0 : i32
    scf.if %2 {
      %c0_8 = arith.constant 0 : index
      %c0_9 = arith.constant 0 : index
      %9 = vector.load %arg4[%c0_8, %c0_9] : memref<1x128xf32, #tpu.memory_space<vmem>>, vector<1x128xf32>
      %10 = vector.shape_cast %9 : vector<1x128xf32> to vector<1x128xf32>
      %11 = vector.broadcast %10 : vector<1x128xf32> to vector<8x128xf32>
      %c0_10 = arith.constant 0 : index
      %c0_11 = arith.constant 0 : index
      %12 = vector.load %arg5[%c0_10, %c0_11] : memref<8x128xf32, #tpu.memory_space<vmem>>, vector<8x128xf32>
      tpu.vector_store %arg5[%c0_10, %c0_11], %11 {strides = array<i32>} : memref<8x128xf32, #tpu.memory_space<vmem>>, vector<8x128xf32>,
    } else {
    }
    %c0 = arith.constant 0 : index
    %c0_1 = arith.constant 0 : index
    %3 = vector.load %arg2[%c0, %c0_1] : memref<8x32xf32, #tpu.memory_space<vmem>>, vector<8x32xf32>
    %c0_2 = arith.constant 0 : index
    %c0_3 = arith.constant 0 : index
    %4 = vector.load %arg3[%c0_2, %c0_3] : memref<32x128xf32, #tpu.memory_space<vmem>>, vector<32x128xf32>
    %c0_4 = arith.constant 0 : index
    %c0_5 = arith.constant 0 : index
    %5 = vector.load %arg5[%c0_4, %c0_5] : memref<8x128xf32, #tpu.memory_space<vmem>>, vector<8x128xf32>
    %cst = arith.constant dense<0.000000e+00> : vector<8x128xf32>
    %6 = tpu.matmul %3, %4, %cst {dimension_numbers = #tpu.dot_dimension_numbers<[1], [0], [0], [1], [0, 0, 1, 1], [], []>} : vector<8x32xf32>, vector<32x128xf32>, vector<8x128xf32> -> vector<8x128xf32>
    %7 = arith.addf %5, %6 : vector<8x128xf32>
    %c0_6 = arith.constant 0 : index
    %c0_7 = arith.constant 0 : index
    %8 = vector.load %arg5[%c0_6, %c0_7] : memref<8x128xf32, #tpu.memory_space<vmem>>, vector<8x128xf32>
    tpu.vector_store %arg5[%c0_6, %c0_7], %7 {strides = array<i32>} : memref<8x128xf32, #tpu.memory_space<vmem>>, vector<8x128xf32>,
    return
  }
  func.func @transform_0(%arg0: i32, %arg1: i32) -> (i32, i32) {
    %c0_i32 = arith.constant 0 : i32
    return %arg0, %arg1 : i32, i32
  }
  func.func @transform_1(%arg0: i32, %arg1: i32) -> (i32, i32) {
    %c0_i32 = arith.constant 0 : i32
    %c0_i32_0 = arith.constant 0 : i32
    %c0_i32_1 = arith.constant 0 : i32
    return %c0_i32, %c0_i32_0 : i32, i32
  }
  func.func @transform_2(%arg0: i32, %arg1: i32) -> (i32, i32) {
    %c0_i32 = arith.constant 0 : i32
    %c0_i32_0 = arith.constant 0 : i32
    %c0_i32_1 = arith.constant 0 : i32
    return %c0_i32, %c0_i32_0 : i32, i32
  }
  func.func @transform_3(%arg0: i32, %arg1: i32) -> (i32, i32) {
    %c0_i32 = arith.constant 0 : i32
    %c0_i32_0 = arith.constant 0 : i32
    return %arg0, %c0_i32 : i32, i32
  }
}

</mosaic_0001>

<bundles_post_ra>
// kernel: tpu_custom_call.1
= control target key start
LH: loop header
LB: loop body
LE: loop exit
PB: predicated region body
PF: predicated region fallthrough
CT: control target
= control target key end

     0   :  { %8 = vsyncpa [#allocation3], 0  ;;  %s226_s0 = inlined_call_operand.hbm [shape: f32[8,32], index: 0, kind: input, shape index: {}]   ;;  %s227_s1 = inlined_call_operand.hbm [shape: f32[32,128], index: 1, kind: input, shape index: {}]   ;;  %s228_s2 = inlined_call_operand.vmem [shape: f32[1,128], index: 2, kind: input, shape index: {}]   ;;  %s229_s3 = inlined_call_operand.hbm [shape: f32[8,128], index: 3, kind: output, shape index: {}]  }
   0x1   :  { %9 = vsyncpa [#allocation6], 0 }
   0x2   :  { %10 = vsyncpa [#allocation4], 0  ;;  %s16_s14 = sshll.u32 %s226_s0, 4  ;;  %s189_s15 = smov [#allocation2]   ;;  %s17_s14 = int_to_ptr.hbm [resolvable:$true] %s16_s14 }
   0x3   :  { %s18_s16 = sshll.u32 %s189_s15, 4  ;;  %s26_s19 = sshll.u32 %s227_s1, 4  ;;  %s19_s16 = int_to_ptr.vmem [resolvable:$true] %s18_s16  ;;  %s27_s19 = int_to_ptr.hbm [resolvable:$true] %s26_s19 }
   0x4   :  { %21 = dma.hbm_to_vmem [thread:$0]  %s17_s14, 128, %s19_s16, [#allocation3]  }
   0x5   :  { %s190_s20 = smov [#allocation5]   ;;  %s191_s22 = smov 128  }
   0x6   :  { %s28_s21 = sshll.u32 %s190_s20, 4  ;;  %s192_s23 = smov 8   ;;  %s29_s21 = int_to_ptr.vmem [resolvable:$true] %s28_s21 }
   0x7   :  { %34 = dma.hbm_to_vmem [thread:$0]  %s27_s19, 512, %s29_s21, [#allocation6], %s191_s22, %s191_s22, %s192_s23  }
   0x8   :  { %183 = dma.done.wait [#allocation3], 128  }
   0x9   :  { %184 = vsyncadd [#allocation3], 4294967168 }
   0xa   :  { %185 = dma.done.wait [#allocation6], 512  }
   0xb   :  { %186 = vsyncadd [#allocation6], 4294966784  ;;  %v58_v0 = vld [vmem:[#allocation5 + $0x18] sm:$0xff]  ;;  %v57_v1 = vld [vmem:[#allocation5 + $0x10] sm:$0xff]  ;;  %vm60_vm0 = vcmask 261120   ;;  %s193_s24 = smov [#allocation7]  }
   0xc   :  { %76 = vmatpush.msra.mxu0 %v58_v0  ;;  %v56_v2 = vld [vmem:[#allocation5 + $0x8] sm:$0xff]  ;;  %v55_v3 = vld [vmem:[#allocation5] sm:$0xff]  ;;  %v54_v4 = vld [vmem:[#allocation2] sm:$0xff]  ;;  %s91_s25 = sshll.u32 %s193_s24, 4  ;;  %s93_s28 = sshll.u32 %s229_s3, 4  ;;  %s92_s25 = int_to_ptr.vmem [resolvable:$true] %s91_s25  ;;  %s94_s28 = int_to_ptr.hbm [resolvable:$true] %s93_s28 }
   0xd   :  { %v110_v5 = vld [vmem:[%s228_s2] ss:$0 sm:$0xff] }
   0xe   :  { %77 = vmatpush.msra.mxu0 %v57_v1 }
  0x10   :  { %78 = vmatpush.msra.mxu0 %v56_v2 }
  0x12   :  { %79 = vmatpush.msra.mxu0 %v55_v3 }
  0x13   :  { %104 = vmatmul.msk.f32.vlgmr.msra.gmra.mxu0 %vm60_vm0, %v54_v4 }
  0x90   :  { %v81_v6 = vpop.f32.mrf.mxu0 }
  0x91   :  { %v84_v7 = vadd.f32 %v110_v5, %v81_v6 }
  0x93   :  { %85 = vst [vmem:[#allocation7] sm:$0xff] %v84_v7 }
  0x94   :  { %96 = dma.vmem_to_hbm [thread:$0]  %s92_s25, 128, %s94_s28, [#allocation4]  }
  0x95   :  { %187 = dma.done.wait [#allocation4], 128  }
  0x96   :  { %188 = vsyncadd [#allocation4], 4294967168 }
  0x97   :  { %101 = vsyncpa [#allocation3], 1 }
  0x98   :  { %102 = vsyncpa [#allocation6], 1 }
  0x99   :  { %103 = vsyncpa [#allocation4], 1 }

</bundles_post_ra>
